<compile_context>
chip_gen: v7x
topology: tpu7x:2x2x1
jax: 0.10.0
libtpu: 0.0.40
codegen_flags: <defaults>
</compile_context>

<pallas_src>
import functools

import jax
import jax.numpy as jnp
from jax.experimental import pallas as pl
from jax.experimental.pallas import tpu as pltpu

LANES = 128
MAX_BLOCK_ROWS = 2048          # (2048, 128) f32 = 1 MiB per stream per buffer
ACC_ROWS = 8                   # (8, 128) f32 vector accumulator
SMALL_N_THRESHOLD = 1 << 16    # below this, plain XLA beats the kernel launch


def _round_down(x, m):
    return (x // m) * m


def _num_partials():
    """2 partial sums only on v7x (2 TensorCores/chip); 1 on v5e/v6e."""
    try:
        kind = jax.devices()[0].device_kind.lower()
    except Exception:
        return 1
    return 2 if ("v7" in kind or "tpu7" in kind) else 1


def _tb_loss_kernel(logz_ref, f_ref, b_ref, r_ref, *rest,
                    steps, block_rows, lambda_entropy, use_entropy):
    """Per partial c: accumulate sum((log_Z + f - b - r)^2 - lambda*entropy)."""
    if use_entropy:
        e_ref, out_ref, acc_ref = rest
    else:
        out_ref, acc_ref = rest

    s = pl.program_id(1)   # reduction step ("arbitrary" axis)

    @pl.when(s == 0)
    def _():
        acc_ref[...] = jnp.zeros_like(acc_ref)

    logz = logz_ref[0, 0]
    f = f_ref[...].astype(jnp.float32)
    b = b_ref[...].astype(jnp.float32)
    r = r_ref[...].astype(jnp.float32)
    t = (logz + f) - b - r
    contrib = t * t
    if use_entropy:
        contrib = contrib - jnp.float32(lambda_entropy) * e_ref[...].astype(jnp.float32)

    # (block_rows, 128) -> (G, 8, 128) row groups -> VALU adds into (8, 128).
    acc_ref[...] += contrib.reshape(block_rows // ACC_ROWS, ACC_ROWS, LANES).sum(axis=0)

    @pl.when(s == steps - 1)
    def _():
        out_ref[...] = acc_ref[...].reshape(1, ACC_ROWS, LANES)


def trajectory_balance_loss(forward_logprobs,
                            backward_logprobs,
                            log_rewards,
                            entropy=None,
                            *,
                            log_Z,
                            lambda_entropy=0.01,
                            min_pallas_elems=SMALL_N_THRESHOLD):
    """JAX wrapper reproducing TrajectoryBalanceLoss.forward (scalar f32)."""
    f = jnp.asarray(forward_logprobs)
    b = jnp.asarray(backward_logprobs)
    r = jnp.asarray(log_rewards)
    n = f.shape[0]
    lambda_entropy = float(lambda_entropy)
    use_entropy = (entropy is not None) and (lambda_entropy > 0.0)
    e = jnp.asarray(entropy) if use_entropy else None
    logz32 = jnp.asarray(log_Z, jnp.float32)

    def _jnp_partial_sum(fs, bs, rs, es):
        t = (logz32 + fs.astype(jnp.float32)
             - bs.astype(jnp.float32) - rs.astype(jnp.float32))
        out = jnp.sum(t * t)
        if use_entropy:
            out = out - jnp.float32(lambda_entropy) * jnp.sum(es.astype(jnp.float32))
        return out

    # ---- derive tiling ------------------------------------------------------
    rows_full = n // LANES
    vec_streams = [f, b, r] + ([e] if use_entropy else [])
    itemsizes = [jnp.dtype(x.dtype).itemsize for x in vec_streams]
    min_item = min(itemsizes)
    row_align = ACC_ROWS if min_item >= 4 else ACC_ROWS * (4 // min_item)

    num_partials = _num_partials()
    if rows_full < 2 * MAX_BLOCK_ROWS:
        num_partials = 1           # never shrink blocks just to split a tiny grid

    use_pallas = (n >= min_pallas_elems) and (rows_full >= num_partials * row_align)
    if not use_pallas:
        # Small-batch fast path: XLA fusion of a few-KB reduction wins.
        return _jnp_partial_sum(f, b, r, e) / jnp.float32(n)

    rows_per_part = rows_full // num_partials
    steps = max(1, -(-rows_per_part // MAX_BLOCK_ROWS))          # cdiv
    block_rows = _round_down(rows_per_part // steps, row_align)  # >= row_align
    rows_kernel = num_partials * steps * block_rows
    n_kernel = rows_kernel * LANES

    def tile2d(x):
        n_lane = rows_full * LANES
        if n_lane == n:
            return x.reshape(rows_full, LANES)        # zero-copy (metadata only)
        # Ragged (<128-elem) tail: one prefix slice; the tail is summed in jnp.
        return x[:n_lane].reshape(rows_full, LANES)

    operands = [logz32.reshape(1, 1), tile2d(f), tile2d(b), tile2d(r)]
    vec_spec = pl.BlockSpec((block_rows, LANES), lambda c, s: (c * steps + s, 0))
    in_specs = [pl.BlockSpec(memory_space=pltpu.SMEM),  # log_Z scalar
                vec_spec, vec_spec, vec_spec]
    if use_entropy:
        operands.append(tile2d(e))
        in_specs.append(vec_spec)

    # VMEM budget: double-buffered input blocks + headroom (v7x has 64 MiB/TC).
    vec_block_bytes = sum(block_rows * LANES * it for it in itemsizes)
    vmem_limit = int(min(64 << 20, max(16 << 20, 3 * vec_block_bytes + (2 << 20))))

    kernel = functools.partial(
        _tb_loss_kernel,
        steps=steps,
        block_rows=block_rows,
        lambda_entropy=lambda_entropy,
        use_entropy=use_entropy,
    )

    partials = pl.pallas_call(
        kernel,
        out_shape=jax.ShapeDtypeStruct((num_partials, ACC_ROWS, LANES), jnp.float32),
        grid=(num_partials, steps),
        in_specs=in_specs,
        out_specs=pl.BlockSpec((1, ACC_ROWS, LANES), lambda c, s: (c, 0, 0)),
        scratch_shapes=[pltpu.VMEM((ACC_ROWS, LANES), jnp.float32)],
        compiler_params=pltpu.CompilerParams(
            dimension_semantics=("parallel", "arbitrary"),
            vmem_limit_bytes=vmem_limit,
        ),
    )(*operands)

    total = jnp.sum(partials)
    if n_kernel < n:
        # Tiny leftover (sub-block rows + sub-lane tail) summed in plain jnp.
        total = total + _jnp_partial_sum(
            f[n_kernel:], b[n_kernel:], r[n_kernel:],
            e[n_kernel:] if use_entropy else None)
    return total / jnp.float32(n)


def trajectory_balance_loss_ref(f, b, r, e, log_Z, lambda_entropy):
    """Pure-JAX reference matching the PyTorch semantics (f32 math)."""
    f32 = lambda x: jnp.asarray(x, jnp.float32)
    t = f32(log_Z) + f32(f) - f32(b) - f32(r)
    loss = jnp.mean(t * t)
    if e is not None and lambda_entropy > 0:
        loss = loss - lambda_entropy * jnp.mean(f32(e))
    return loss


if __name__ == "__main__":
    lam = 0.01

    def make_inputs(seed, n, dtype=jnp.float32):
        k1, k2, k3, k4 = jax.random.split(jax.random.PRNGKey(seed), 4)
        fwd = jax.random.normal(k1, (n,), jnp.float32).astype(dtype)
        bwd = jax.random.normal(k2, (n,), jnp.float32).astype(dtype)
        rew = jax.random.normal(k3, (n,), jnp.float32).astype(dtype)
        ent = jax.random.uniform(k4, (n,), jnp.float32).astype(dtype)
        return fwd, bwd, rew, ent

    # case 1: module-scale small batch, with entropy -> jnp fast path
    f, b, r, e = make_inputs(0, 8)
    out = jax.block_until_ready(
        trajectory_balance_loss(f, b, r, e, log_Z=jnp.float32(0.0), lambda_entropy=lam))
    ref = trajectory_balance_loss_ref(f, b, r, e, 0.0, lam)
    assert jnp.allclose(out, ref, rtol=1e-5, atol=1e-5), (out, ref)

    # case 2: small ragged batch, no entropy -> jnp fast path
    f, b, r, e = make_inputs(1, 300)
    out = jax.block_until_ready(
        trajectory_balance_loss(f, b, r, None, log_Z=jnp.float32(0.3), lambda_entropy=lam))
    ref = trajectory_balance_loss_ref(f, b, r, None, 0.3, lam)
    assert jnp.allclose(out, ref, rtol=1e-5, atol=1e-5), (out, ref)

    # case 3: aligned batch through the Pallas kernel (zero-copy, no remainder)
    f, b, r, e = make_inputs(2, 65536)
    out = jax.block_until_ready(
        trajectory_balance_loss(f, b, r, e, log_Z=jnp.float32(0.0), lambda_entropy=lam,
                                min_pallas_elems=0))
    ref = trajectory_balance_loss_ref(f, b, r, e, 0.0, lam)
    assert jnp.allclose(out, ref, rtol=1e-4, atol=1e-4), (out, ref)

    # case 4: ragged batch + nonzero log_Z (kernel bulk + tiny jnp remainder)
    f, b, r, e = make_inputs(3, 300007)
    out = jax.block_until_ready(
        trajectory_balance_loss(f, b, r, e, log_Z=jnp.float32(0.7), lambda_entropy=lam,
                                min_pallas_elems=0))
    ref = trajectory_balance_loss_ref(f, b, r, e, 0.7, lam)
    assert jnp.allclose(out, ref, rtol=1e-4, atol=1e-4), (out, ref)

    # case 5: large aligned batch (multi-step reduction; 2 partials on v7x)
    f, b, r, e = make_inputs(4, 1 << 20)
    out = jax.block_until_ready(
        trajectory_balance_loss(f, b, r, e, log_Z=jnp.float32(0.1), lambda_entropy=lam))
    ref = trajectory_balance_loss_ref(f, b, r, e, 0.1, lam)
    assert jnp.allclose(out, ref, rtol=1e-4, atol=1e-4), (out, ref)

    # case 6: bf16 inputs streamed natively (no wrapper f32 cast, in-kernel upcast)
    f, b, r, e = make_inputs(5, 65536, jnp.bfloat16)
    out = jax.block_until_ready(
        trajectory_balance_loss(f, b, r, e, log_Z=jnp.float32(0.2), lambda_entropy=lam,
                                min_pallas_elems=0))
    ref = trajectory_balance_loss_ref(f, b, r, e, 0.2, lam)
    assert jnp.allclose(out, ref, rtol=1e-3, atol=1e-3), (out, ref)

    print("KERNEL_OK")
</pallas_src>

<mosaic_0001>
module attributes {stable_mosaic.version = 11 : i64} {
  func.func @_tb_loss_kernel(%arg0: i32, %arg1: i32, %arg2: memref<1x1xf32, #tpu.memory_space<smem>>, %arg3: memref<512x128xf32, #tpu.memory_space<vmem>>, %arg4: memref<512x128xf32, #tpu.memory_space<vmem>>, %arg5: memref<512x128xf32, #tpu.memory_space<vmem>>, %arg6: memref<512x128xf32, #tpu.memory_space<vmem>>, %arg7: memref<1x8x128xf32, #tpu.memory_space<vmem>>, %arg8: memref<8x128xf32, #tpu.memory_space<vmem>>) attributes {dimension_semantics = [#tpu.dimension_semantics<parallel>, #tpu.dimension_semantics<arbitrary>], iteration_bounds = array<i64: 1, 1>, scalar_prefetch = 0 : i64, scratch_operands = 1 : i64, tpu.core_type = #tpu.core_type<tc>, window_params = [{transform_indices = @transform_0, window_bounds = array<i64: 1, 1>}, {transform_indices = @transform_1, window_bounds = array<i64: 512, 128>}, {transform_indices = @transform_2, window_bounds = array<i64: 512, 128>}, {transform_indices = @transform_3, window_bounds = array<i64: 512, 128>}, {transform_indices = @transform_4, window_bounds = array<i64: 512, 128>}, {transform_indices = @transform_5, window_bounds = array<i64: 1, 8, 128>}]} {
    %c0_i32 = arith.constant 0 : i32
    %0 = arith.cmpi eq, %arg1, %c0_i32 : i32
    %1 = arith.extui %0 : i1 to i32
    %c0_i32_0 = arith.constant 0 : i32
    %2 = arith.cmpi ne, %1, %c0_i32_0 : i32
    scf.if %2 {
      %cst_17 = arith.constant 0.000000e+00 : f32
      %24 = vector.broadcast %cst_17 : f32 to vector<8x128xf32>
      %c0_18 = arith.constant 0 : index
      %c0_19 = arith.constant 0 : index
      %25 = vector.load %arg8[%c0_18, %c0_19] : memref<8x128xf32, #tpu.memory_space<vmem>>, vector<8x128xf32>
      tpu.vector_store %arg8[%c0_18, %c0_19], %24 {strides = array<i32>} : memref<8x128xf32, #tpu.memory_space<vmem>>, vector<8x128xf32>,
    } else {
    }
    %c0 = arith.constant 0 : index
    %c0_1 = arith.constant 0 : index
    %3 = memref.load %arg2[%c0, %c0_1] : memref<1x1xf32, #tpu.memory_space<smem>>
    %c0_2 = arith.constant 0 : index
    %c0_3 = arith.constant 0 : index
    %4 = vector.load %arg3[%c0_2, %c0_3] : memref<512x128xf32, #tpu.memory_space<vmem>>, vector<512x128xf32>
    %c0_4 = arith.constant 0 : index
    %c0_5 = arith.constant 0 : index
    %5 = vector.load %arg4[%c0_4, %c0_5] : memref<512x128xf32, #tpu.memory_space<vmem>>, vector<512x128xf32>
    %c0_6 = arith.constant 0 : index
    %c0_7 = arith.constant 0 : index
    %6 = vector.load %arg5[%c0_6, %c0_7] : memref<512x128xf32, #tpu.memory_space<vmem>>, vector<512x128xf32>
    %7 = vector.broadcast %3 : f32 to vector<512x128xf32>
    %8 = arith.addf %7, %4 : vector<512x128xf32>
    %9 = arith.subf %8, %5 : vector<512x128xf32>
    %10 = arith.subf %9, %6 : vector<512x128xf32>
    %11 = arith.mulf %10, %10 : vector<512x128xf32>
    %c0_8 = arith.constant 0 : index
    %c0_9 = arith.constant 0 : index
    %12 = vector.load %arg6[%c0_8, %c0_9] : memref<512x128xf32, #tpu.memory_space<vmem>>, vector<512x128xf32>
    %cst = arith.constant 0.00999999977 : f32
    %13 = vector.broadcast %cst : f32 to vector<512x128xf32>
    %14 = arith.mulf %13, %12 : vector<512x128xf32>
    %15 = arith.subf %11, %14 : vector<512x128xf32>
    %c0_10 = arith.constant 0 : index
    %c0_11 = arith.constant 0 : index
    %16 = vector.load %arg8[%c0_10, %c0_11] : memref<8x128xf32, #tpu.memory_space<vmem>>, vector<8x128xf32>
    %17 = vector.shape_cast %15 : vector<512x128xf32> to vector<64x8x128xf32>
    %cst_12 = arith.constant dense<0.000000e+00> : vector<8x128xf32>
    %18 = vector.multi_reduction <add>, %17, %cst_12 [0] : vector<64x8x128xf32> to vector<8x128xf32>
    %19 = arith.addf %16, %18 : vector<8x128xf32>
    %c0_13 = arith.constant 0 : index
    %c0_14 = arith.constant 0 : index
    %20 = vector.load %arg8[%c0_13, %c0_14] : memref<8x128xf32, #tpu.memory_space<vmem>>, vector<8x128xf32>
    tpu.vector_store %arg8[%c0_13, %c0_14], %19 {strides = array<i32>} : memref<8x128xf32, #tpu.memory_space<vmem>>, vector<8x128xf32>,
    %c0_i32_15 = arith.constant 0 : i32
    %21 = arith.cmpi eq, %arg1, %c0_i32_15 : i32
    %22 = arith.extui %21 : i1 to i32
    %c0_i32_16 = arith.constant 0 : i32
    %23 = arith.cmpi ne, %22, %c0_i32_16 : i32
    scf.if %23 {
      %c0_17 = arith.constant 0 : index
      %c0_18 = arith.constant 0 : index
      %24 = vector.load %arg8[%c0_17, %c0_18] : memref<8x128xf32, #tpu.memory_space<vmem>>, vector<8x128xf32>
      %25 = vector.shape_cast %24 : vector<8x128xf32> to vector<1x8x128xf32>
      %c0_19 = arith.constant 0 : index
      %c0_20 = arith.constant 0 : index
      %c0_21 = arith.constant 0 : index
      %26 = vector.load %arg7[%c0_19, %c0_20, %c0_21] : memref<1x8x128xf32, #tpu.memory_space<vmem>>, vector<1x8x128xf32>
      tpu.vector_store %arg7[%c0_19, %c0_20, %c0_21], %25 {strides = array<i32>} : memref<1x8x128xf32, #tpu.memory_space<vmem>>, vector<1x8x128xf32>,
    } else {
    }
    return
  }
  func.func @transform_0(%arg0: i32, %arg1: i32) -> (i32, i32) {
    %c0_i32 = arith.constant 0 : i32
    %c0_i32_0 = arith.constant 0 : i32
    %c0_i32_1 = arith.constant 0 : i32
    return %c0_i32, %c0_i32_0 : i32, i32
  }
  func.func @transform_1(%arg0: i32, %arg1: i32) -> (i32, i32) {
    %c1_i32 = arith.constant 1 : i32
    %0 = arith.muli %arg0, %c1_i32 : i32
    %1 = arith.addi %0, %arg1 : i32
    %c0_i32 = arith.constant 0 : i32
    %c0_i32_0 = arith.constant 0 : i32
    return %1, %c0_i32 : i32, i32
  }
  func.func @transform_2(%arg0: i32, %arg1: i32) -> (i32, i32) {
    %c1_i32 = arith.constant 1 : i32
    %0 = arith.muli %arg0, %c1_i32 : i32
    %1 = arith.addi %0, %arg1 : i32
    %c0_i32 = arith.constant 0 : i32
    %c0_i32_0 = arith.constant 0 : i32
    return %1, %c0_i32 : i32, i32
  }
  func.func @transform_3(%arg0: i32, %arg1: i32) -> (i32, i32) {
    %c1_i32 = arith.constant 1 : i32
    %0 = arith.muli %arg0, %c1_i32 : i32
    %1 = arith.addi %0, %arg1 : i32
    %c0_i32 = arith.constant 0 : i32
    %c0_i32_0 = arith.constant 0 : i32
    return %1, %c0_i32 : i32, i32
  }
  func.func @transform_4(%arg0: i32, %arg1: i32) -> (i32, i32) {
    %c1_i32 = arith.constant 1 : i32
    %0 = arith.muli %arg0, %c1_i32 : i32
    %1 = arith.addi %0, %arg1 : i32
    %c0_i32 = arith.constant 0 : i32
    %c0_i32_0 = arith.constant 0 : i32
    return %1, %c0_i32 : i32, i32
  }
  func.func @transform_5(%arg0: i32, %arg1: i32) -> (i32, i32, i32) {
    %c0_i32 = arith.constant 0 : i32
    %c0_i32_0 = arith.constant 0 : i32
    %c0_i32_1 = arith.constant 0 : i32
    return %arg0, %c0_i32, %c0_i32_0 : i32, i32, i32
  }
}

</mosaic_0001>

<bundles_post_ra>
// kernel: tpu_custom_call.1
= control target key start
LH: loop header
LB: loop body
LE: loop exit
PB: predicated region body
PF: predicated region fallthrough
CT: control target
= control target key end

     0   :  { %11 = vsyncpa [#allocation5], 0  ;;  %s1153_s0 = inlined_call_operand.<no memory space> [shape: f32[1,1], index: 0, kind: input, shape index: {}]   ;;  %s1154_s1 = inlined_call_operand.hbm [shape: f32[512,128], index: 1, kind: input, shape index: {}]   ;;  %s1155_s2 = inlined_call_operand.hbm [shape: f32[512,128], index: 2, kind: input, shape index: {}]   ;;  %s1156_s3 = inlined_call_operand.hbm [shape: f32[512,128], index: 3, kind: input, shape index: {}]   ;;  %s1157_s4 = inlined_call_operand.hbm [shape: f32[512,128], index: 4, kind: input, shape index: {}]   ;;  %s1158_s5 = inlined_call_operand.hbm [shape: f32[1,8,128], index: 5, kind: output, shape index: {}]  }
   0x1   :  { %12 = vsyncpa [#allocation8], 0 }
   0x2   :  { %13 = vsyncpa [#allocation11], 0 }
   0x3   :  { %14 = vsyncpa [#allocation6], 0  ;;  %s961_s18 = smov [#allocation7]   ;;  %s962_s20 = smov [#allocation4]  }
   0x4   :  { %s42_s19 = sshll.u32 %s961_s18, 4  ;;  %s26_s21 = sshll.u32 %s962_s20, 4  ;;  %s43_s19 = int_to_ptr.vmem [resolvable:$true] %s42_s19  ;;  %s998_s21 = int_to_ptr.vmem [resolvable:$true] %s26_s21 }
   0x5   :  { %s843_s24 = scalar_lea.hbm %s1155_s2, 8192 }
   0x6   :  { %p844_p0 = scmp.ne.s32.totalorder %s1155_s2, %s843_s24  ;;  %p847_p1 = scmp.lt.u32.totalorder %s843_s24, %s1155_s2 }
   0x8   :  { %p849_p2 = pnand %p847_p1, %p844_p0 }
   0xa   :  { %852 = shalt.err (!%p849_p2)
}
   0xb   :  { %s853_s29 = scalar_lea.vmem %s43_s19, 8192  ;;  %p858_p4 = scmp.lt.s32.totalorder %s43_s19, %s43_s19 }
   0xc   :  { %p854_p3 = scmp.ne.s32.totalorder %s43_s19, %s853_s29  ;;  %p859_p5 = scmp.lt.s32.totalorder %s853_s29, %s853_s29 }
   0xe   :  { %p860_p6 = por %p859_p5, %p858_p4 }
  0x10   :  { %p861_p7 = pnand %p860_p6, %p854_p3 }
  0x12   :  { %864 = shalt.err (!%p861_p7)
}
  0x13   :  { %s963_s30 = smov 128   ;;  %s964_s6 = smov 8  }
  0x14   :  { %48 = dma.hbm_to_vmem [thread:$0]  %s1155_s2, 8192, %s43_s19, [#allocation8], %s963_s30, %s963_s30, %s964_s6  }
  0x15   :  { %s865_s11 = scalar_lea.hbm %s1154_s1, 8192 }
  0x16   :  { %p866_p8 = scmp.ne.s32.totalorder %s1154_s1, %s865_s11  ;;  %p869_p9 = scmp.lt.u32.totalorder %s865_s11, %s1154_s1 }
  0x18   :  { %p871_p10 = pnand %p869_p9, %p866_p8 }
  0x1a   :  { %874 = shalt.err (!%p871_p10)
}
  0x1b   :  { %s875_s16 = scalar_lea.vmem %s998_s21, 8192  ;;  %p880_p12 = scmp.lt.s32.totalorder %s998_s21, %s998_s21 }
  0x1c   :  { %p876_p11 = scmp.ne.s32.totalorder %s998_s21, %s875_s16  ;;  %p881_p13 = scmp.lt.s32.totalorder %s875_s16, %s875_s16 }
  0x1e   :  { %p882_p0 = por %p881_p13, %p880_p12 }
  0x20   :  { %p883_p1 = pnand %p882_p0, %p876_p11 }
  0x22   :  { %886 = shalt.err (!%p883_p1)
}
  0x23   :  { %32 = dma.hbm_to_vmem [thread:$0]  %s1154_s1, 8192, %s998_s21, [#allocation5], %s963_s30, %s963_s30, %s964_s6  }
  0x24   :  { %s965_s18 = smov [#allocation9]   ;;  %s966_s20 = smov [#allocation10]  }
  0x25   :  { %s58_s19 = sshll.u32 %s965_s18, 4  ;;  %s74_s22 = sshll.u32 %s966_s20, 4  ;;  %s59_s19 = int_to_ptr.vmem [resolvable:$true] %s58_s19  ;;  %s1035_s22 = int_to_ptr.vmem [resolvable:$true] %s74_s22 }
  0x26   :  { %s887_s25 = scalar_lea.hbm %s1156_s3, 8192 }
  0x27   :  { %p888_p2 = scmp.ne.s32.totalorder %s1156_s3, %s887_s25  ;;  %p891_p3 = scmp.lt.u32.totalorder %s887_s25, %s1156_s3 }
  0x29   :  { %p893_p4 = pnand %p891_p3, %p888_p2 }
  0x2b   :  { %896 = shalt.err (!%p893_p4)
}
  0x2c   :  { %s897_s1 = scalar_lea.vmem %s59_s19, 8192  ;;  %p902_p6 = scmp.lt.s32.totalorder %s59_s19, %s59_s19 }
  0x2d   :  { %p898_p5 = scmp.ne.s32.totalorder %s59_s19, %s897_s1  ;;  %p903_p7 = scmp.lt.s32.totalorder %s897_s1, %s897_s1 }
  0x2f   :  { %p904_p8 = por %p903_p7, %p902_p6 }
  0x31   :  { %p905_p9 = pnand %p904_p8, %p898_p5 }
  0x33   :  { %908 = shalt.err (!%p905_p9)
}
  0x34   :  { %64 = dma.hbm_to_vmem [thread:$0]  %s1156_s3, 8192, %s59_s19, [#allocation8], %s963_s30, %s963_s30, %s964_s6  }
  0x35   :  { %s909_s10 = scalar_lea.hbm %s1157_s4, 8192 }
  0x36   :  { %p910_p10 = scmp.ne.s32.totalorder %s1157_s4, %s909_s10  ;;  %p913_p11 = scmp.lt.u32.totalorder %s909_s10, %s1157_s4 }
  0x38   :  { %p915_p12 = pnand %p913_p11, %p910_p10 }
  0x3a   :  { %918 = shalt.err (!%p915_p12)
}
  0x3b   :  { %s919_s15 = scalar_lea.vmem %s1035_s22, 8192  ;;  %p924_p0 = scmp.lt.s32.totalorder %s1035_s22, %s1035_s22 }
  0x3c   :  { %p920_p13 = scmp.ne.s32.totalorder %s1035_s22, %s919_s15  ;;  %p925_p1 = scmp.lt.s32.totalorder %s919_s15, %s919_s15 }
  0x3e   :  { %p926_p2 = por %p925_p1, %p924_p0 }
  0x40   :  { %p927_p3 = pnand %p926_p2, %p920_p13 }
  0x42   :  { %930 = shalt.err (!%p927_p3)
}
  0x43   :  { %80 = dma.hbm_to_vmem [thread:$0]  %s1157_s4, 8192, %s1035_s22, [#allocation11], %s963_s30, %s963_s30, %s964_s6  }
  0x44   :  { %953 = dma.done.wait [#allocation5], 8192  }
  0x45   :  { %954 = vsyncadd [#allocation5], 4294959104 }
  0x46   :  { %955 = dma.done.wait [#allocation8], 16384  }
  0x47   :  { %956 = vsyncadd [#allocation8], 4294950912 }
  0x48   :  { %957 = dma.done.wait [#allocation11], 8192  }
  0x49   :  { %958 = vsyncadd [#allocation11], 4294959104  ;;  %v107_v0 = vld [vmem:[#allocation4] sm:$0xff]  ;;  %v108_v1 = vld [vmem:[#allocation4 + $0x8] sm:$0xff]  ;;  %v1075_v2 = vstv %s1153_s0  ;;  %s967_s0 = smov [#allocation12]  }
  0x4a   :  { %v109_v3 = vld [vmem:[#allocation4 + $0x10] sm:$0xff]  ;;  %v300_v4 = vadd.f32 %v1075_v2, %v107_v0  ;;  %v301_v5 = vadd.f32 %v1075_v2, %v108_v1  ;;  %v171_v6 = vld [vmem:[#allocation7] sm:$0xff]  ;;  %v172_v7 = vld [vmem:[#allocation7 + $0x8] sm:$0xff]  ;;  %s825_s4 = sshll.u32 %s967_s0, 4  ;;  %s826_s4 = int_to_ptr.vmem [resolvable:$true] %s825_s4 }
  0x4b   :  { %v302_v8 = vadd.f32 %v1075_v2, %v109_v3  ;;  %v110_v9 = vld [vmem:[#allocation4 + $0x18] sm:$0xff]  ;;  %v173_v10 = vld [vmem:[#allocation7 + $0x10] sm:$0xff]  ;;  %v235_v13 = vld [vmem:[#allocation9] sm:$0xff]  ;;  %s931_s30 = scalar_lea.vmem %s826_s4, 128  ;;  %p936_p5 = scmp.lt.s32.totalorder %s826_s4, %s826_s4 }
  0x4c   :  { %v364_v11 = vsub.f32 %v300_v4, %v171_v6  ;;  %v365_v12 = vsub.f32 %v301_v5, %v172_v7  ;;  %v236_v14 = vld [vmem:[#allocation9 + $0x8] sm:$0xff]  ;;  %v303_v15 = vadd.f32 %v1075_v2, %v110_v9  ;;  %v111_v17 = vld [vmem:[#allocation4 + $0x20] sm:$0xff]  ;;  %v174_v18 = vld [vmem:[#allocation7 + $0x18] sm:$0xff]  ;;  %p932_p4 = scmp.ne.s32.totalorder %s826_s4, %s931_s30  ;;  %p937_p6 = scmp.lt.s32.totalorder %s931_s30, %s931_s30 }
  0x4d   :  { %v366_v16 = vsub.f32 %v302_v8, %v173_v10  ;;  %v237_v19 = vld [vmem:[#allocation9 + $0x10] sm:$0xff]  ;;  %v556_v22 = vld [vmem:[#allocation10] sm:$0xff]  ;;  %v557_v23 = vld [vmem:[#allocation10 + $0x8] sm:$0xff]  ;;  %v304_v26 = vadd.f32 %v1075_v2, %v111_v17 }
  0x4e   :  { %v428_v20 = vsub.f32 %v364_v11, %v235_v13  ;;  %v429_v21 = vsub.f32 %v365_v12, %v236_v14  ;;  %v112_v24 = vld [vmem:[#allocation4 + $0x28] sm:$0xff]  ;;  %v113_v25 = vld [vmem:[#allocation4 + $0x30] sm:$0xff]  ;;  %v367_v27 = vsub.f32 %v303_v15, %v174_v18  ;;  %v175_v29 = vld [vmem:[#allocation7 + $0x20] sm:$0xff]  ;;  %v620_v33 = vmul.f32 0.01, %v556_v22  ;;  %p938_p7 = por %p937_p6, %p936_p5 }
  0x4f   :  { %v430_v28 = vsub.f32 %v366_v16, %v237_v19  ;;  %v238_v30 = vld [vmem:[#allocation9 + $0x18] sm:$0xff]  ;;  %v621_v34 = vmul.f32 0.01, %v557_v23  ;;  %v558_v35 = vld [vmem:[#allocation10 + $0x10] sm:$0xff]  ;;  %v305_v36 = vadd.f32 %v1075_v2, %v112_v24  ;;  %v176_v38 = vld [vmem:[#allocation7 + $0x28] sm:$0xff]  ;;  %v306_v39 = vadd.f32 %v1075_v2, %v113_v25 }
  0x50   :  { %v492_v31 = vmul.f32 %v428_v20, %v428_v20  ;;  %v493_v32 = vmul.f32 %v429_v21, %v429_v21  ;;  %v114_v37 = vld [vmem:[#allocation4 + $0x38] sm:$0xff]  ;;  %v368_v40 = vsub.f32 %v304_v26, %v175_v29  ;;  %v431_v41 = vsub.f32 %v367_v27, %v238_v30  ;;  %v115_v42 = vld [vmem:[#allocation4 + $0x40] sm:$0xff]  ;;  %v177_v43 = vld [vmem:[#allocation7 + $0x30] sm:$0xff]  ;;  %p939_p8 = pnand %p938_p7, %p932_p4 }
  0x51   :  { %v239_v44 = vld [vmem:[#allocation9 + $0x20] sm:$0xff]  ;;  %v494_v45 = vmul.f32 %v430_v28, %v430_v28  ;;  %v622_v46 = vmul.f32 0.01, %v558_v35  ;;  %v559_v49 = vld [vmem:[#allocation10 + $0x18] sm:$0xff]  ;;  %v307_v50 = vadd.f32 %v1075_v2, %v114_v37  ;;  %v369_v51 = vsub.f32 %v305_v36, %v176_v38  ;;  %v116_v52 = vld [vmem:[#allocation4 + $0x48] sm:$0xff] }
  0x52   :  { %v684_v47 = vsub.f32 %v492_v31, %v620_v33  ;;  %v685_v48 = vsub.f32 %v493_v32, %v621_v34  ;;  %v178_v53 = vld [vmem:[#allocation7 + $0x38] sm:$0xff]  ;;  %v240_v54 = vld [vmem:[#allocation9 + $0x28] sm:$0xff]  ;;  %v308_v55 = vadd.f32 %v1075_v2, %v115_v42  ;;  %v370_v56 = vsub.f32 %v306_v39, %v177_v43  ;;  %v117_v58 = vld [vmem:[#allocation4 + $0x50] sm:$0xff] }
  0x53   :  { %v432_v57 = vsub.f32 %v368_v40, %v239_v44  ;;  %v179_v59 = vld [vmem:[#allocation7 + $0x40] sm:$0xff]  ;;  %v241_v60 = vld [vmem:[#allocation9 + $0x30] sm:$0xff]  ;;  %v495_v61 = vmul.f32 %v431_v41, %v431_v41  ;;  %v623_v62 = vmul.f32 0.01, %v559_v49  ;;  %v686_v63 = vsub.f32 %v494_v45, %v622_v46  ;;  %v118_v3 = vld [vmem:[#allocation4 + $0x58] sm:$0xff] }
  0x54   :  { %v749_v0 = vadd.f32 %v685_v48, %v684_v47  ;;  %v560_v1 = vld [vmem:[#allocation10 + $0x20] sm:$0xff]  ;;  %v309_v4 = vadd.f32 %v1075_v2, %v116_v52  ;;  %v371_v5 = vsub.f32 %v307_v50, %v178_v53  ;;  %v433_v6 = vsub.f32 %v369_v51, %v240_v54  ;;  %v180_v7 = vld [vmem:[#allocation7 + $0x48] sm:$0xff]  ;;  %v242_v8 = vld [vmem:[#allocation9 + $0x38] sm:$0xff] }
  0x55   :  { %v310_v9 = vadd.f32 %v1075_v2, %v117_v58  ;;  %v372_v10 = vsub.f32 %v308_v55, %v179_v59  ;;  %v434_v11 = vsub.f32 %v370_v56, %v241_v60  ;;  %v561_v12 = vld [vmem:[#allocation10 + $0x28] sm:$0xff]  ;;  %v119_v13 = vld [vmem:[#allocation4 + $0x60] sm:$0xff]  ;;  %v181_v14 = vld [vmem:[#allocation7 + $0x50] sm:$0xff]  ;;  %v496_v16 = vmul.f32 %v432_v57, %v432_v57 }
  0x56   :  { %v243_v15 = vld [vmem:[#allocation9 + $0x40] sm:$0xff]  ;;  %v624_v17 = vmul.f32 0.01, %v560_v1  ;;  %v687_v18 = vsub.f32 %v495_v61, %v623_v62  ;;  %v750_v19 = vadd.f32 %v749_v0, %v686_v63  ;;  %v311_v20 = vadd.f32 %v1075_v2, %v118_v3  ;;  %v562_v21 = vld [vmem:[#allocation10 + $0x30] sm:$0xff]  ;;  %v120_v22 = vld [vmem:[#allocation4 + $0x68] sm:$0xff] }
  0x57   :  { %v182_v23 = vld [vmem:[#allocation7 + $0x58] sm:$0xff]  ;;  %v373_v24 = vsub.f32 %v309_v4, %v180_v7  ;;  %v435_v25 = vsub.f32 %v371_v5, %v242_v8  ;;  %v497_v26 = vmul.f32 %v433_v6, %v433_v6  ;;  %v625_v27 = vmul.f32 0.01, %v561_v12  ;;  %v244_v28 = vld [vmem:[#allocation9 + $0x48] sm:$0xff]  ;;  %v121_v33 = vld [vmem:[#allocation4 + $0x70] sm:$0xff] }
  0x58   :  { %v312_v29 = vadd.f32 %v1075_v2, %v119_v13  ;;  %v374_v30 = vsub.f32 %v310_v9, %v181_v14  ;;  %v436_v31 = vsub.f32 %v372_v10, %v243_v15  ;;  %v563_v32 = vld [vmem:[#allocation10 + $0x38] sm:$0xff]  ;;  %v183_v34 = vld [vmem:[#allocation7 + $0x60] sm:$0xff]  ;;  %v245_v35 = vld [vmem:[#allocation9 + $0x50] sm:$0xff]  ;;  %v498_v36 = vmul.f32 %v434_v11, %v434_v11 }
  0x59   :  { %v626_v37 = vmul.f32 0.01, %v562_v21  ;;  %v688_v38 = vsub.f32 %v496_v16, %v624_v17  ;;  %v751_v39 = vadd.f32 %v750_v19, %v687_v18  ;;  %v313_v40 = vadd.f32 %v1075_v2, %v120_v22  ;;  %v564_v42 = vld [vmem:[#allocation10 + $0x40] sm:$0xff]  ;;  %v122_v43 = vld [vmem:[#allocation4 + $0x78] sm:$0xff]  ;;  %v184_v44 = vld [vmem:[#allocation7 + $0x68] sm:$0xff] }
  0x5a   :  { %v375_v41 = vsub.f32 %v311_v20, %v182_v23  ;;  %v246_v45 = vld [vmem:[#allocation9 + $0x58] sm:$0xff]  ;;  %v437_v46 = vsub.f32 %v373_v24, %v244_v28  ;;  %v499_v47 = vmul.f32 %v435_v25, %v435_v25  ;;  %v627_v48 = vmul.f32 0.01, %v563_v32  ;;  %v565_v53 = vld [vmem:[#allocation10 + $0x48] sm:$0xff]  ;;  %v123_v54 = vld [vmem:[#allocation4 + $0x80] sm:$0xff] }
  0x5b   :  { %v689_v49 = vsub.f32 %v497_v26, %v625_v27  ;;  %v314_v50 = vadd.f32 %v1075_v2, %v121_v33  ;;  %v376_v51 = vsub.f32 %v312_v29, %v183_v34  ;;  %v438_v52 = vsub.f32 %v374_v30, %v245_v35  ;;  %v185_v55 = vld [vmem:[#allocation7 + $0x70] sm:$0xff]  ;;  %v247_v56 = vld [vmem:[#allocation9 + $0x60] sm:$0xff]  ;;  %v124_v1 = vld [vmem:[#allocation4 + $0x88] sm:$0xff] }
  0x5c   :  { %v500_v57 = vmul.f32 %v436_v31, %v436_v31  ;;  %v628_v58 = vmul.f32 0.01, %v564_v42  ;;  %v690_v59 = vsub.f32 %v498_v36, %v626_v37  ;;  %v752_v60 = vadd.f32 %v751_v39, %v688_v38  ;;  %v566_v0 = vld [vmem:[#allocation10 + $0x50] sm:$0xff]  ;;  %v186_v3 = vld [vmem:[#allocation7 + $0x78] sm:$0xff]  ;;  %v248_v4 = vld [vmem:[#allocation9 + $0x68] sm:$0xff] }
  0x5d   :  { %v315_v61 = vadd.f32 %v1075_v2, %v122_v43  ;;  %v377_v62 = vsub.f32 %v313_v40, %v184_v44  ;;  %v439_v63 = vsub.f32 %v375_v41, %v246_v45  ;;  %v501_v5 = vmul.f32 %v437_v46, %v437_v46  ;;  %v567_v12 = vld [vmem:[#allocation10 + $0x58] sm:$0xff]  ;;  %v125_v13 = vld [vmem:[#allocation4 + $0x90] sm:$0xff]  ;;  %v187_v14 = vld [vmem:[#allocation7 + $0x80] sm:$0xff] }
  0x5e   :  { %v629_v6 = vmul.f32 0.01, %v565_v53  ;;  %v691_v7 = vsub.f32 %v499_v47, %v627_v48  ;;  %v753_v8 = vadd.f32 %v752_v60, %v689_v49  ;;  %v316_v9 = vadd.f32 %v1075_v2, %v123_v54  ;;  %v249_v15 = vld [vmem:[#allocation9 + $0x70] sm:$0xff]  ;;  %v568_v23 = vld [vmem:[#allocation10 + $0x60] sm:$0xff]  ;;  %v126_v24 = vld [vmem:[#allocation4 + $0x98] sm:$0xff] }
  0x5f   :  { %v378_v10 = vsub.f32 %v314_v50, %v185_v55  ;;  %v440_v11 = vsub.f32 %v376_v51, %v247_v56  ;;  %v502_v16 = vmul.f32 %v438_v52, %v438_v52  ;;  %v630_v17 = vmul.f32 0.01, %v566_v0  ;;  %v188_v25 = vld [vmem:[#allocation7 + $0x88] sm:$0xff]  ;;  %v250_v26 = vld [vmem:[#allocation9 + $0x78] sm:$0xff]  ;;  %v127_v35 = vld [vmem:[#allocation4 + $0xa0] sm:$0xff] }
  0x60   :  { %v692_v18 = vsub.f32 %v500_v57, %v628_v58  ;;  %v754_v19 = vadd.f32 %v753_v8, %v690_v59  ;;  %v317_v20 = vadd.f32 %v1075_v2, %v124_v1  ;;  %v379_v21 = vsub.f32 %v315_v61, %v186_v3  ;;  %v569_v34 = vld [vmem:[#allocation10 + $0x68] sm:$0xff]  ;;  %v189_v36 = vld [vmem:[#allocation7 + $0x90] sm:$0xff]  ;;  %v251_v37 = vld [vmem:[#allocation9 + $0x80] sm:$0xff] }
  0x61   :  { %v441_v22 = vsub.f32 %v377_v62, %v248_v4  ;;  %v503_v27 = vmul.f32 %v439_v63, %v439_v63  ;;  %v631_v28 = vmul.f32 0.01, %v567_v12  ;;  %v693_v29 = vsub.f32 %v501_v5, %v629_v6  ;;  %v570_v45 = vld [vmem:[#allocation10 + $0x70] sm:$0xff]  ;;  %v128_v46 = vld [vmem:[#allocation4 + $0xa8] sm:$0xff]  ;;  %v190_v47 = vld [vmem:[#allocation7 + $0x98] sm:$0xff] }
  0x62   :  { %v755_v30 = vadd.f32 %v754_v19, %v691_v7  ;;  %v318_v31 = vadd.f32 %v1075_v2, %v125_v13  ;;  %v380_v32 = vsub.f32 %v316_v9, %v187_v14  ;;  %v442_v33 = vsub.f32 %v378_v10, %v249_v15  ;;  %v252_v48 = vld [vmem:[#allocation9 + $0x88] sm:$0xff]  ;;  %v571_v56 = vld [vmem:[#allocation10 + $0x78] sm:$0xff]  ;;  %v129_v57 = vld [vmem:[#allocation4 + $0xb0] sm:$0xff] }
  0x63   :  { %v504_v38 = vmul.f32 %v440_v11, %v440_v11  ;;  %v632_v39 = vmul.f32 0.01, %v568_v23  ;;  %v694_v40 = vsub.f32 %v502_v16, %v630_v17  ;;  %v319_v42 = vadd.f32 %v1075_v2, %v126_v24  ;;  %v191_v58 = vld [vmem:[#allocation7 + $0xa0] sm:$0xff]  ;;  %v253_v59 = vld [vmem:[#allocation9 + $0x90] sm:$0xff]  ;;  %v130_v5 = vld [vmem:[#allocation4 + $0xb8] sm:$0xff] }
  0x64   :  { %v756_v41 = vadd.f32 %v755_v30, %v692_v18  ;;  %v381_v43 = vsub.f32 %v317_v20, %v188_v25  ;;  %v443_v44 = vsub.f32 %v379_v21, %v250_v26  ;;  %v505_v49 = vmul.f32 %v441_v22, %v441_v22  ;;  %v572_v4 = vld [vmem:[#allocation10 + $0x80] sm:$0xff]  ;;  %v192_v6 = vld [vmem:[#allocation7 + $0xa8] sm:$0xff]  ;;  %v254_v7 = vld [vmem:[#allocation9 + $0x98] sm:$0xff] }
  0x65   :  { %v633_v50 = vmul.f32 0.01, %v569_v34  ;;  %v695_v51 = vsub.f32 %v503_v27, %v631_v28  ;;  %v320_v53 = vadd.f32 %v1075_v2, %v127_v35  ;;  %v382_v54 = vsub.f32 %v318_v31, %v189_v36  ;;  %v573_v15 = vld [vmem:[#allocation10 + $0x88] sm:$0xff]  ;;  %v131_v16 = vld [vmem:[#allocation4 + $0xc0] sm:$0xff]  ;;  %v193_v17 = vld [vmem:[#allocation7 + $0xb0] sm:$0xff] }
  0x66   :  { %v757_v52 = vadd.f32 %v756_v41, %v693_v29  ;;  %v444_v55 = vsub.f32 %v380_v32, %v251_v37  ;;  %v506_v60 = vmul.f32 %v442_v33, %v442_v33  ;;  %v634_v61 = vmul.f32 0.01, %v570_v45  ;;  %v255_v18 = vld [vmem:[#allocation9 + $0xa0] sm:$0xff]  ;;  %v574_v26 = vld [vmem:[#allocation10 + $0x90] sm:$0xff]  ;;  %v132_v27 = vld [vmem:[#allocation4 + $0xc8] sm:$0xff] }
  0x67   :  { %v696_v62 = vsub.f32 %v504_v38, %v632_v39  ;;  %v321_v0 = vadd.f32 %v1075_v2, %v128_v46  ;;  %v383_v1 = vsub.f32 %v319_v42, %v190_v47  ;;  %v445_v3 = vsub.f32 %v381_v43, %v252_v48  ;;  %v194_v28 = vld [vmem:[#allocation7 + $0xb8] sm:$0xff]  ;;  %v256_v29 = vld [vmem:[#allocation9 + $0xa8] sm:$0xff]  ;;  %v133_v38 = vld [vmem:[#allocation4 + $0xd0] sm:$0xff] }
  0x68   :  { %v758_v63 = vadd.f32 %v757_v52, %v694_v40  ;;  %v507_v8 = vmul.f32 %v443_v44, %v443_v44  ;;  %v635_v9 = vmul.f32 0.01, %v571_v56  ;;  %v697_v10 = vsub.f32 %v505_v49, %v633_v50  ;;  %v575_v37 = vld [vmem:[#allocation10 + $0x98] sm:$0xff]  ;;  %v195_v39 = vld [vmem:[#allocation7 + $0xc0] sm:$0xff]  ;;  %v257_v40 = vld [vmem:[#allocation9 + $0xb0] sm:$0xff] }
  0x69   :  { %v322_v12 = vadd.f32 %v1075_v2, %v129_v57  ;;  %v384_v13 = vsub.f32 %v320_v53, %v191_v58  ;;  %v446_v14 = vsub.f32 %v382_v54, %v253_v59  ;;  %v508_v19 = vmul.f32 %v444_v55, %v444_v55  ;;  %v576_v48 = vld [vmem:[#allocation10 + $0xa0] sm:$0xff]  ;;  %v134_v49 = vld [vmem:[#allocation4 + $0xd8] sm:$0xff]  ;;  %v196_v50 = vld [vmem:[#allocation7 + $0xc8] sm:$0xff] }
  0x6a   :  { %v759_v11 = vadd.f32 %v758_v63, %v695_v51  ;;  %v636_v20 = vmul.f32 0.01, %v572_v4  ;;  %v698_v21 = vsub.f32 %v506_v60, %v634_v61  ;;  %v323_v23 = vadd.f32 %v1075_v2, %v130_v5  ;;  %v258_v51 = vld [vmem:[#allocation9 + $0xb8] sm:$0xff]  ;;  %v577_v59 = vld [vmem:[#allocation10 + $0xa8] sm:$0xff]  ;;  %v135_v60 = vld [vmem:[#allocation4 + $0xe0] sm:$0xff] }
  0x6b   :  { %v385_v24 = vsub.f32 %v321_v0, %v192_v6  ;;  %v447_v25 = vsub.f32 %v383_v1, %v254_v7  ;;  %v509_v30 = vmul.f32 %v445_v3, %v445_v3  ;;  %v637_v31 = vmul.f32 0.01, %v573_v15  ;;  %v197_v61 = vld [vmem:[#allocation7 + $0xd0] sm:$0xff] }
  0x6c   :  { %v760_v22 = vadd.f32 %v759_v11, %v696_v62  ;;  %v699_v32 = vsub.f32 %v507_v8, %v635_v9  ;;  %v324_v34 = vadd.f32 %v1075_v2, %v131_v16  ;;  %v386_v35 = vsub.f32 %v322_v12, %v193_v17  ;;  %v259_v62 = vld [vmem:[#allocation9 + $0xc0] sm:$0xff]  ;;  %v578_v7 = vld [vmem:[#allocation10 + $0xb0] sm:$0xff]  ;;  %v136_v8 = vld [vmem:[#allocation4 + $0xe8] sm:$0xff] }
  0x6d   :  { %v448_v36 = vsub.f32 %v384_v13, %v255_v18  ;;  %v510_v41 = vmul.f32 %v446_v14, %v446_v14  ;;  %v638_v42 = vmul.f32 0.01, %v574_v26  ;;  %v700_v43 = vsub.f32 %v508_v19, %v636_v20  ;;  %v198_v9 = vld [vmem:[#allocation7 + $0xd8] sm:$0xff]  ;;  %v137_v19 = vld [vmem:[#allocation4 + $0xf0] sm:$0xff]  ;;  %v199_v20 = vld [vmem:[#allocation7 + $0xe0] sm:$0xff] }
  0x6e   :  { %v761_v33 = vadd.f32 %v760_v22, %v697_v10  ;;  %v325_v45 = vadd.f32 %v1075_v2, %v132_v27  ;;  %v387_v46 = vsub.f32 %v323_v23, %v194_v28  ;;  %v449_v47 = vsub.f32 %v385_v24, %v256_v29  ;;  %v260_v10 = vld [vmem:[#allocation9 + $0xc8] sm:$0xff]  ;;  %v579_v18 = vld [vmem:[#allocation10 + $0xb8] sm:$0xff]  ;;  %v580_v29 = vld [vmem:[#allocation10 + $0xc0] sm:$0xff] }
  0x6f   :  { %v511_v52 = vmul.f32 %v447_v25, %v447_v25  ;;  %v639_v53 = vmul.f32 0.01, %v575_v37  ;;  %v701_v54 = vsub.f32 %v509_v30, %v637_v31  ;;  %v326_v56 = vadd.f32 %v1075_v2, %v133_v38  ;;  %v138_v30 = vld [vmem:[#allocation4 + $0xf8] sm:$0xff]  ;;  %v200_v31 = vld [vmem:[#allocation7 + $0xe8] sm:$0xff] }
  0x70   :  { %v762_v44 = vadd.f32 %v761_v33, %v698_v21  ;;  %v388_v57 = vsub.f32 %v324_v34, %v195_v39  ;;  %v450_v58 = vsub.f32 %v386_v35, %v257_v40  ;;  %v512_v63 = vmul.f32 %v448_v36, %v448_v36  ;;  %v261_v21 = vld [vmem:[#allocation9 + $0xd0] sm:$0xff]  ;;  %v581_v40 = vld [vmem:[#allocation10 + $0xc8] sm:$0xff] }
  0x71   :  { %v640_v0 = vmul.f32 0.01, %v576_v48  ;;  %v702_v1 = vsub.f32 %v510_v41, %v638_v42  ;;  %v327_v4 = vadd.f32 %v1075_v2, %v134_v49  ;;  %v389_v5 = vsub.f32 %v325_v45, %v196_v50  ;;  %v139_v41 = vld [vmem:[#allocation4 + $0x100] sm:$0xff]  ;;  %v201_v42 = vld [vmem:[#allocation7 + $0xf0] sm:$0xff] }
  0x72   :  { %v763_v55 = vadd.f32 %v762_v44, %v699_v32  ;;  %v451_v6 = vsub.f32 %v387_v46, %v258_v51  ;;  %v513_v11 = vmul.f32 %v449_v47, %v449_v47  ;;  %v641_v12 = vmul.f32 0.01, %v577_v59  ;;  %v262_v32 = vld [vmem:[#allocation9 + $0xd8] sm:$0xff]  ;;  %v582_v51 = vld [vmem:[#allocation10 + $0xd0] sm:$0xff] }
  0x73   :  { %v703_v13 = vsub.f32 %v511_v52, %v639_v53  ;;  %v328_v15 = vadd.f32 %v1075_v2, %v135_v60  ;;  %v390_v16 = vsub.f32 %v326_v56, %v197_v61  ;;  %v452_v17 = vsub.f32 %v388_v57, %v259_v62  ;;  %v140_v52 = vld [vmem:[#allocation4 + $0x108] sm:$0xff]  ;;  %v202_v53 = vld [vmem:[#allocation7 + $0xf8] sm:$0xff] }
  0x74   :  { %v764_v3 = vadd.f32 %v763_v55, %v700_v43  ;;  %v514_v22 = vmul.f32 %v450_v58, %v450_v58  ;;  %v642_v23 = vmul.f32 0.01, %v578_v7  ;;  %v704_v24 = vsub.f32 %v512_v63, %v640_v0  ;;  %v263_v43 = vld [vmem:[#allocation9 + $0xe0] sm:$0xff]  ;;  %v583_v62 = vld [vmem:[#allocation10 + $0xd8] sm:$0xff]  ;;  %v141_v63 = vld [vmem:[#allocation4 + $0x110] sm:$0xff] }
  0x75   :  { %v329_v26 = vadd.f32 %v1075_v2, %v136_v8  ;;  %v391_v27 = vsub.f32 %v327_v4, %v198_v9  ;;  %v453_v28 = vsub.f32 %v389_v5, %v260_v10  ;;  %v515_v33 = vmul.f32 %v451_v6, %v451_v6  ;;  %v203_v0 = vld [vmem:[#allocation7 + $0x100] sm:$0xff] }
  0x76   :  { %v765_v14 = vadd.f32 %v764_v3, %v701_v54  ;;  %v643_v34 = vmul.f32 0.01, %v579_v18  ;;  %v705_v35 = vsub.f32 %v513_v11, %v641_v12  ;;  %v330_v37 = vadd.f32 %v1075_v2, %v137_v19  ;;  %v264_v54 = vld [vmem:[#allocation9 + $0xe8] sm:$0xff]  ;;  %v584_v10 = vld [vmem:[#allocation10 + $0xe0] sm:$0xff]  ;;  %v142_v11 = vld [vmem:[#allocation4 + $0x118] sm:$0xff] }
  0x77   :  { %v392_v38 = vsub.f32 %v328_v15, %v199_v20  ;;  %v454_v39 = vsub.f32 %v390_v16, %v261_v21  ;;  %v516_v44 = vmul.f32 %v452_v17, %v452_v17  ;;  %v644_v45 = vmul.f32 0.01, %v580_v29  ;;  %v204_v12 = vld [vmem:[#allocation7 + $0x108] sm:$0xff] }
  0x78   :  { %v766_v25 = vadd.f32 %v765_v14, %v702_v1  ;;  %v706_v46 = vsub.f32 %v514_v22, %v642_v23  ;;  %v331_v48 = vadd.f32 %v1075_v2, %v138_v30  ;;  %v393_v49 = vsub.f32 %v329_v26, %v200_v31  ;;  %v265_v1 = vld [vmem:[#allocation9 + $0xf0] sm:$0xff]  ;;  %v585_v21 = vld [vmem:[#allocation10 + $0xe8] sm:$0xff]  ;;  %v143_v22 = vld [vmem:[#allocation4 + $0x120] sm:$0xff] }
  0x79   :  { %v455_v50 = vsub.f32 %v391_v27, %v262_v32  ;;  %v517_v55 = vmul.f32 %v453_v28, %v453_v28  ;;  %v645_v56 = vmul.f32 0.01, %v581_v40  ;;  %v707_v57 = vsub.f32 %v515_v33, %v643_v34  ;;  %v205_v23 = vld [vmem:[#allocation7 + $0x110] sm:$0xff]  ;;  %v144_v33 = vld [vmem:[#allocation4 + $0x128] sm:$0xff]  ;;  %v206_v34 = vld [vmem:[#allocation7 + $0x118] sm:$0xff] }
  0x7a   :  { %v767_v36 = vadd.f32 %v766_v25, %v703_v13  ;;  %v332_v59 = vadd.f32 %v1075_v2, %v139_v41  ;;  %v394_v60 = vsub.f32 %v330_v37, %v201_v42  ;;  %v456_v61 = vsub.f32 %v392_v38, %v263_v43  ;;  %v266_v13 = vld [vmem:[#allocation9 + $0xf8] sm:$0xff]  ;;  %v586_v32 = vld [vmem:[#allocation10 + $0xf0] sm:$0xff] }
  0x7b   :  { %v518_v3 = vmul.f32 %v454_v39, %v454_v39  ;;  %v646_v4 = vmul.f32 0.01, %v582_v51  ;;  %v708_v5 = vsub.f32 %v516_v44, %v644_v45  ;;  %v333_v7 = vadd.f32 %v1075_v2, %v140_v52  ;;  %v587_v43 = vld [vmem:[#allocation10 + $0xf8] sm:$0xff]  ;;  %v145_v44 = vld [vmem:[#allocation4 + $0x130] sm:$0xff]  ;;  %v207_v45 = vld [vmem:[#allocation7 + $0x120] sm:$0xff] }
  0x7c   :  { %v768_v47 = vadd.f32 %v767_v36, %v704_v24  ;;  %v395_v8 = vsub.f32 %v331_v48, %v202_v53  ;;  %v457_v9 = vsub.f32 %v393_v49, %v264_v54  ;;  %v519_v14 = vmul.f32 %v455_v50, %v455_v50  ;;  %v267_v24 = vld [vmem:[#allocation9 + $0x100] sm:$0xff] }
  0x7d   :  { %v647_v15 = vmul.f32 0.01, %v583_v62  ;;  %v709_v16 = vsub.f32 %v517_v55, %v645_v56  ;;  %v334_v18 = vadd.f32 %v1075_v2, %v141_v63  ;;  %v396_v19 = vsub.f32 %v332_v59, %v203_v0  ;;  %v588_v54 = vld [vmem:[#allocation10 + $0x100] sm:$0xff]  ;;  %v146_v55 = vld [vmem:[#allocation4 + $0x138] sm:$0xff]  ;;  %v208_v56 = vld [vmem:[#allocation7 + $0x128] sm:$0xff] }
  0x7e   :  { %v769_v58 = vadd.f32 %v768_v47, %v705_v35  ;;  %v458_v20 = vsub.f32 %v394_v60, %v265_v1  ;;  %v520_v25 = vmul.f32 %v456_v61, %v456_v61  ;;  %v648_v26 = vmul.f32 0.01, %v584_v10  ;;  %v268_v35 = vld [vmem:[#allocation9 + $0x108] sm:$0xff] }
  0x7f   :  { %v710_v27 = vsub.f32 %v518_v3, %v646_v4  ;;  %v335_v29 = vadd.f32 %v1075_v2, %v142_v11  ;;  %v397_v30 = vsub.f32 %v333_v7, %v204_v12  ;;  %v459_v31 = vsub.f32 %v395_v8, %v266_v13  ;;  %v589_v1 = vld [vmem:[#allocation10 + $0x108] sm:$0xff]  ;;  %v147_v3 = vld [vmem:[#allocation4 + $0x140] sm:$0xff]  ;;  %v209_v4 = vld [vmem:[#allocation7 + $0x130] sm:$0xff] }
  0x80   :  { %v770_v6 = vadd.f32 %v769_v58, %v706_v46  ;;  %v521_v36 = vmul.f32 %v457_v9, %v457_v9  ;;  %v649_v37 = vmul.f32 0.01, %v585_v21  ;;  %v711_v38 = vsub.f32 %v519_v14, %v647_v15  ;;  %v269_v46 = vld [vmem:[#allocation9 + $0x110] sm:$0xff]  ;;  %v148_v14 = vld [vmem:[#allocation4 + $0x148] sm:$0xff]  ;;  %v210_v15 = vld [vmem:[#allocation7 + $0x138] sm:$0xff] }
  0x81   :  { %v336_v40 = vadd.f32 %v1075_v2, %v143_v22  ;;  %v398_v41 = vsub.f32 %v334_v18, %v205_v23  ;;  %v460_v42 = vsub.f32 %v396_v19, %v267_v24  ;;  %v522_v47 = vmul.f32 %v458_v20, %v458_v20  ;;  %v590_v13 = vld [vmem:[#allocation10 + $0x110] sm:$0xff]  ;;  %v591_v24 = vld [vmem:[#allocation10 + $0x118] sm:$0xff] }
  0x82   :  { %v771_v17 = vadd.f32 %v770_v6, %v707_v57  ;;  %v650_v48 = vmul.f32 0.01, %v586_v32  ;;  %v712_v49 = vsub.f32 %v520_v25, %v648_v26  ;;  %v337_v51 = vadd.f32 %v1075_v2, %v144_v33  ;;  %v270_v57 = vld [vmem:[#allocation9 + $0x118] sm:$0xff]  ;;  %v149_v25 = vld [vmem:[#allocation4 + $0x150] sm:$0xff]  ;;  %v211_v26 = vld [vmem:[#allocation7 + $0x140] sm:$0xff] }
  0x83   :  { %v399_v52 = vsub.f32 %v335_v29, %v206_v34  ;;  %v461_v53 = vsub.f32 %v397_v30, %v268_v35  ;;  %v523_v58 = vmul.f32 %v459_v31, %v459_v31  ;;  %v651_v59 = vmul.f32 0.01, %v587_v43  ;;  %v592_v35 = vld [vmem:[#allocation10 + $0x120] sm:$0xff] }
  0x84   :  { %v772_v28 = vadd.f32 %v771_v17, %v708_v5  ;;  %v713_v60 = vsub.f32 %v521_v36, %v649_v37  ;;  %v338_v62 = vadd.f32 %v1075_v2, %v145_v44  ;;  %v400_v63 = vsub.f32 %v336_v40, %v207_v45  ;;  %v271_v5 = vld [vmem:[#allocation9 + $0x120] sm:$0xff]  ;;  %v150_v36 = vld [vmem:[#allocation4 + $0x158] sm:$0xff]  ;;  %v212_v37 = vld [vmem:[#allocation7 + $0x148] sm:$0xff] }
  0x85   :  { %v462_v0 = vsub.f32 %v398_v41, %v269_v46  ;;  %v524_v6 = vmul.f32 %v460_v42, %v460_v42  ;;  %v652_v7 = vmul.f32 0.01, %v588_v54  ;;  %v714_v8 = vsub.f32 %v522_v47, %v650_v48  ;;  %v593_v46 = vld [vmem:[#allocation10 + $0x128] sm:$0xff]  ;;  %v151_v47 = vld [vmem:[#allocation4 + $0x160] sm:$0xff]  ;;  %v213_v48 = vld [vmem:[#allocation7 + $0x150] sm:$0xff] }
  0x86   :  { %v773_v39 = vadd.f32 %v772_v28, %v709_v16  ;;  %v339_v10 = vadd.f32 %v1075_v2, %v146_v55  ;;  %v401_v11 = vsub.f32 %v337_v51, %v208_v56  ;;  %v463_v12 = vsub.f32 %v399_v52, %v270_v57  ;;  %v272_v16 = vld [vmem:[#allocation9 + $0x128] sm:$0xff]  ;;  %v594_v57 = vld [vmem:[#allocation10 + $0x130] sm:$0xff] }
  0x87   :  { %v525_v17 = vmul.f32 %v461_v53, %v461_v53  ;;  %v653_v18 = vmul.f32 0.01, %v589_v1  ;;  %v715_v19 = vsub.f32 %v523_v58, %v651_v59  ;;  %v340_v21 = vadd.f32 %v1075_v2, %v147_v3  ;;  %v152_v58 = vld [vmem:[#allocation4 + $0x168] sm:$0xff]  ;;  %v214_v59 = vld [vmem:[#allocation7 + $0x158] sm:$0xff] }
  0x88   :  { %v774_v50 = vadd.f32 %v773_v39, %v710_v27  ;;  %v402_v22 = vsub.f32 %v338_v62, %v209_v4  ;;  %v464_v23 = vsub.f32 %v400_v63, %v271_v5  ;;  %v273_v27 = vld [vmem:[#allocation9 + $0x130] sm:$0xff]  ;;  %v526_v28 = vmul.f32 %v462_v0, %v462_v0  ;;  %v595_v5 = vld [vmem:[#allocation10 + $0x138] sm:$0xff] }
  0x89   :  { %v654_v29 = vmul.f32 0.01, %v590_v13  ;;  %v716_v30 = vsub.f32 %v524_v6, %v652_v7  ;;  %v341_v32 = vadd.f32 %v1075_v2, %v148_v14  ;;  %v403_v33 = vsub.f32 %v339_v10, %v210_v15  ;;  %v153_v6 = vld [vmem:[#allocation4 + $0x170] sm:$0xff]  ;;  %v215_v7 = vld [vmem:[#allocation7 + $0x160] sm:$0xff] }
  0x8a   :  { %v775_v61 = vadd.f32 %v774_v50, %v711_v38  ;;  %v465_v34 = vsub.f32 %v401_v11, %v272_v16  ;;  %v274_v38 = vld [vmem:[#allocation9 + $0x138] sm:$0xff]  ;;  %v527_v39 = vmul.f32 %v463_v12, %v463_v12  ;;  %v655_v40 = vmul.f32 0.01, %v591_v24  ;;  %v596_v16 = vld [vmem:[#allocation10 + $0x140] sm:$0xff] }
  0x8b   :  { %v717_v41 = vsub.f32 %v525_v17, %v653_v18  ;;  %v342_v43 = vadd.f32 %v1075_v2, %v149_v25  ;;  %v404_v44 = vsub.f32 %v340_v21, %v211_v26  ;;  %v466_v45 = vsub.f32 %v402_v22, %v273_v27  ;;  %v154_v17 = vld [vmem:[#allocation4 + $0x178] sm:$0xff]  ;;  %v216_v18 = vld [vmem:[#allocation7 + $0x168] sm:$0xff] }
  0x8c   :  { %v776_v9 = vadd.f32 %v775_v61, %v712_v49  ;;  %v275_v49 = vld [vmem:[#allocation9 + $0x140] sm:$0xff]  ;;  %v528_v50 = vmul.f32 %v464_v23, %v464_v23  ;;  %v656_v51 = vmul.f32 0.01, %v592_v35  ;;  %v718_v52 = vsub.f32 %v526_v28, %v654_v29  ;;  %v597_v27 = vld [vmem:[#allocation10 + $0x148] sm:$0xff]  ;;  %v217_v29 = vld [vmem:[#allocation7 + $0x170] sm:$0xff] }
  0x8d   :  { %v343_v54 = vadd.f32 %v1075_v2, %v150_v36  ;;  %v405_v55 = vsub.f32 %v341_v32, %v212_v37  ;;  %v467_v56 = vsub.f32 %v403_v33, %v274_v38  ;;  %v529_v61 = vmul.f32 %v465_v34, %v465_v34  ;;  %v155_v28 = vld [vmem:[#allocation4 + $0x180] sm:$0xff]  ;;  %v598_v38 = vld [vmem:[#allocation10 + $0x150] sm:$0xff] }
  0x8e   :  { %v777_v20 = vadd.f32 %v776_v9, %v713_v60  ;;  %v276_v60 = vld [vmem:[#allocation9 + $0x148] sm:$0xff]  ;;  %v657_v62 = vmul.f32 0.01, %v593_v46  ;;  %v719_v63 = vsub.f32 %v527_v39, %v655_v40  ;;  %v344_v1 = vadd.f32 %v1075_v2, %v151_v47  ;;  %v218_v40 = vld [vmem:[#allocation7 + $0x178] sm:$0xff] }
  0x8f   :  { %v406_v3 = vsub.f32 %v342_v43, %v213_v48  ;;  %v468_v4 = vsub.f32 %v404_v44, %v275_v49  ;;  %v530_v9 = vmul.f32 %v466_v45, %v466_v45  ;;  %v658_v10 = vmul.f32 0.01, %v594_v57  ;;  %v156_v39 = vld [vmem:[#allocation4 + $0x188] sm:$0xff]  ;;  %v599_v49 = vld [vmem:[#allocation10 + $0x158] sm:$0xff] }
  0x90   :  { %v778_v31 = vadd.f32 %v777_v20, %v714_v8  ;;  %v277_v8 = vld [vmem:[#allocation9 + $0x150] sm:$0xff]  ;;  %v720_v11 = vsub.f32 %v528_v50, %v656_v51  ;;  %v345_v13 = vadd.f32 %v1075_v2, %v152_v58  ;;  %v407_v14 = vsub.f32 %v343_v54, %v214_v59  ;;  %v219_v51 = vld [vmem:[#allocation7 + $0x180] sm:$0xff] }
  0x91   :  { %v469_v15 = vsub.f32 %v405_v55, %v276_v60  ;;  %v531_v20 = vmul.f32 %v467_v56, %v467_v56  ;;  %v659_v21 = vmul.f32 0.01, %v595_v5  ;;  %v721_v22 = vsub.f32 %v529_v61, %v657_v62  ;;  %v157_v50 = vld [vmem:[#allocation4 + $0x190] sm:$0xff]  ;;  %v600_v60 = vld [vmem:[#allocation10 + $0x160] sm:$0xff]  ;;  %v158_v61 = vld [vmem:[#allocation4 + $0x198] sm:$0xff] }
  0x92   :  { %v779_v42 = vadd.f32 %v778_v31, %v715_v19  ;;  %v278_v19 = vld [vmem:[#allocation9 + $0x158] sm:$0xff]  ;;  %v346_v24 = vadd.f32 %v1075_v2, %v153_v6  ;;  %v408_v25 = vsub.f32 %v344_v1, %v215_v7  ;;  %v470_v26 = vsub.f32 %v406_v3, %v277_v8  ;;  %v220_v62 = vld [vmem:[#allocation7 + $0x188] sm:$0xff] }
  0x93   :  { %v532_v31 = vmul.f32 %v468_v4, %v468_v4  ;;  %v660_v32 = vmul.f32 0.01, %v596_v16  ;;  %v722_v33 = vsub.f32 %v530_v9, %v658_v10  ;;  %v347_v35 = vadd.f32 %v1075_v2, %v154_v17  ;;  %v601_v8 = vld [vmem:[#allocation10 + $0x168] sm:$0xff]  ;;  %v159_v9 = vld [vmem:[#allocation4 + $0x1a0] sm:$0xff]  ;;  %v221_v10 = vld [vmem:[#allocation7 + $0x190] sm:$0xff] }
  0x94   :  { %v780_v53 = vadd.f32 %v779_v42, %v716_v30  ;;  %v279_v30 = vld [vmem:[#allocation9 + $0x160] sm:$0xff]  ;;  %v409_v36 = vsub.f32 %v345_v13, %v216_v18  ;;  %v471_v37 = vsub.f32 %v407_v14, %v278_v19  ;;  %v533_v42 = vmul.f32 %v469_v15, %v469_v15  ;;  %v602_v19 = vld [vmem:[#allocation10 + $0x170] sm:$0xff] }
  0x95   :  { %v661_v43 = vmul.f32 0.01, %v597_v27  ;;  %v723_v44 = vsub.f32 %v531_v20, %v659_v21  ;;  %v348_v46 = vadd.f32 %v1075_v2, %v155_v28  ;;  %v410_v47 = vsub.f32 %v346_v24, %v217_v29  ;;  %v160_v20 = vld [vmem:[#allocation4 + $0x1a8] sm:$0xff]  ;;  %v222_v21 = vld [vmem:[#allocation7 + $0x198] sm:$0xff] }
  0x96   :  { %v781_v0 = vadd.f32 %v780_v53, %v717_v41  ;;  %v280_v41 = vld [vmem:[#allocation9 + $0x168] sm:$0xff]  ;;  %v472_v48 = vsub.f32 %v408_v25, %v279_v30  ;;  %v534_v53 = vmul.f32 %v470_v26, %v470_v26  ;;  %v662_v54 = vmul.f32 0.01, %v598_v38  ;;  %v603_v30 = vld [vmem:[#allocation10 + $0x178] sm:$0xff] }
  0x97   :  { %v724_v55 = vsub.f32 %v532_v31, %v660_v32  ;;  %v349_v57 = vadd.f32 %v1075_v2, %v156_v39  ;;  %v411_v58 = vsub.f32 %v347_v35, %v218_v40  ;;  %v473_v59 = vsub.f32 %v409_v36, %v280_v41  ;;  %v161_v31 = vld [vmem:[#allocation4 + $0x1b0] sm:$0xff]  ;;  %v223_v32 = vld [vmem:[#allocation7 + $0x1a0] sm:$0xff] }
  0x98   :  { %v782_v12 = vadd.f32 %v781_v0, %v718_v52  ;;  %v281_v52 = vld [vmem:[#allocation9 + $0x170] sm:$0xff]  ;;  %v535_v0 = vmul.f32 %v471_v37, %v471_v37  ;;  %v663_v1 = vmul.f32 0.01, %v599_v49  ;;  %v725_v3 = vsub.f32 %v533_v42, %v661_v43  ;;  %v604_v41 = vld [vmem:[#allocation10 + $0x180] sm:$0xff]  ;;  %v162_v42 = vld [vmem:[#allocation4 + $0x1b8] sm:$0xff] }
  0x99   :  { %v350_v5 = vadd.f32 %v1075_v2, %v157_v50  ;;  %v412_v6 = vsub.f32 %v348_v46, %v219_v51  ;;  %v474_v7 = vsub.f32 %v410_v47, %v281_v52  ;;  %v664_v13 = vmul.f32 0.01, %v600_v60  ;;  %v224_v43 = vld [vmem:[#allocation7 + $0x1a8] sm:$0xff] }
  0x9a   :  { %v783_v23 = vadd.f32 %v782_v12, %v719_v63  ;;  %v282_v63 = vld [vmem:[#allocation9 + $0x178] sm:$0xff]  ;;  %v536_v12 = vmul.f32 %v472_v48, %v472_v48  ;;  %v726_v14 = vsub.f32 %v534_v53, %v662_v54  ;;  %v351_v16 = vadd.f32 %v1075_v2, %v158_v61  ;;  %v605_v52 = vld [vmem:[#allocation10 + $0x188] sm:$0xff]  ;;  %v163_v53 = vld [vmem:[#allocation4 + $0x1c0] sm:$0xff] }
  0x9b   :  { %v413_v17 = vsub.f32 %v349_v57, %v220_v62  ;;  %v475_v18 = vsub.f32 %v411_v58, %v282_v63  ;;  %v665_v24 = vmul.f32 0.01, %v601_v8  ;;  %v727_v25 = vsub.f32 %v535_v0, %v663_v1  ;;  %v225_v54 = vld [vmem:[#allocation7 + $0x1b0] sm:$0xff]  ;;  %v164_v0 = vld [vmem:[#allocation4 + $0x1c8] sm:$0xff]  ;;  %v226_v1 = vld [vmem:[#allocation7 + $0x1b8] sm:$0xff] }
  0x9c   :  { %v784_v34 = vadd.f32 %v783_v23, %v720_v11  ;;  %v283_v11 = vld [vmem:[#allocation9 + $0x180] sm:$0xff]  ;;  %v537_v23 = vmul.f32 %v473_v59, %v473_v59  ;;  %v352_v27 = vadd.f32 %v1075_v2, %v159_v9  ;;  %v414_v28 = vsub.f32 %v350_v5, %v221_v10  ;;  %v606_v63 = vld [vmem:[#allocation10 + $0x190] sm:$0xff] }
  0x9d   :  { %v476_v29 = vsub.f32 %v412_v6, %v283_v11  ;;  %v666_v35 = vmul.f32 0.01, %v602_v19  ;;  %v728_v36 = vsub.f32 %v536_v12, %v664_v13  ;;  %v353_v38 = vadd.f32 %v1075_v2, %v160_v20  ;;  %v607_v11 = vld [vmem:[#allocation10 + $0x198] sm:$0xff]  ;;  %v165_v12 = vld [vmem:[#allocation4 + $0x1d0] sm:$0xff]  ;;  %v227_v13 = vld [vmem:[#allocation7 + $0x1c0] sm:$0xff] }
  0x9e   :  { %v785_v45 = vadd.f32 %v784_v34, %v721_v22  ;;  %v284_v22 = vld [vmem:[#allocation9 + $0x188] sm:$0xff]  ;;  %v538_v34 = vmul.f32 %v474_v7, %v474_v7  ;;  %v415_v39 = vsub.f32 %v351_v16, %v222_v21  ;;  %v667_v46 = vmul.f32 0.01, %v603_v30 }
  0x9f   :  { %v477_v40 = vsub.f32 %v413_v17, %v284_v22  ;;  %v729_v47 = vsub.f32 %v537_v23, %v665_v24  ;;  %v354_v49 = vadd.f32 %v1075_v2, %v161_v31  ;;  %v416_v50 = vsub.f32 %v352_v27, %v223_v32  ;;  %v608_v22 = vld [vmem:[#allocation10 + $0x1a0] sm:$0xff]  ;;  %v166_v23 = vld [vmem:[#allocation4 + $0x1d8] sm:$0xff]  ;;  %v228_v24 = vld [vmem:[#allocation7 + $0x1c8] sm:$0xff] }
  0xa0   :  { %v786_v56 = vadd.f32 %v785_v45, %v722_v33  ;;  %v285_v33 = vld [vmem:[#allocation9 + $0x190] sm:$0xff]  ;;  %v539_v45 = vmul.f32 %v475_v18, %v475_v18  ;;  %v668_v57 = vmul.f32 0.01, %v604_v41  ;;  %v730_v58 = vsub.f32 %v538_v34, %v666_v35  ;;  %v167_v34 = vld [vmem:[#allocation4 + $0x1e0] sm:$0xff] }
  0xa1   :  { %v478_v51 = vsub.f32 %v414_v28, %v285_v33  ;;  %v355_v60 = vadd.f32 %v1075_v2, %v162_v42  ;;  %v417_v61 = vsub.f32 %v353_v38, %v224_v43  ;;  %v669_v5 = vmul.f32 0.01, %v605_v52  ;;  %v609_v33 = vld [vmem:[#allocation10 + $0x1a8] sm:$0xff]  ;;  %v229_v35 = vld [vmem:[#allocation7 + $0x1d0] sm:$0xff] }
  0xa2   :  { %v787_v4 = vadd.f32 %v786_v56, %v723_v44  ;;  %v286_v44 = vld [vmem:[#allocation9 + $0x198] sm:$0xff]  ;;  %v540_v56 = vmul.f32 %v476_v29, %v476_v29  ;;  %v731_v6 = vsub.f32 %v539_v45, %v667_v46  ;;  %v356_v8 = vadd.f32 %v1075_v2, %v163_v53  ;;  %v168_v45 = vld [vmem:[#allocation4 + $0x1e8] sm:$0xff] }
  0xa3   :  { %v479_v62 = vsub.f32 %v415_v39, %v286_v44  ;;  %v418_v9 = vsub.f32 %v354_v49, %v225_v54  ;;  %v670_v16 = vmul.f32 0.01, %v606_v63  ;;  %v357_v19 = vadd.f32 %v1075_v2, %v164_v0  ;;  %v610_v44 = vld [vmem:[#allocation10 + $0x1b0] sm:$0xff]  ;;  %v230_v46 = vld [vmem:[#allocation7 + $0x1d8] sm:$0xff] }
  0xa4   :  { %v788_v15 = vadd.f32 %v787_v4, %v724_v55  ;;  %v287_v55 = vld [vmem:[#allocation9 + $0x1a0] sm:$0xff]  ;;  %v541_v4 = vmul.f32 %v477_v40, %v477_v40  ;;  %v732_v17 = vsub.f32 %v540_v56, %v668_v57  ;;  %v419_v20 = vsub.f32 %v355_v60, %v226_v1  ;;  %v169_v56 = vld [vmem:[#allocation4 + $0x1f0] sm:$0xff] }
  0xa5   :  { %v480_v10 = vsub.f32 %v416_v50, %v287_v55  ;;  %v671_v27 = vmul.f32 0.01, %v607_v11  ;;  %v358_v30 = vadd.f32 %v1075_v2, %v165_v12  ;;  %v420_v31 = vsub.f32 %v356_v8, %v227_v13  ;;  %v611_v55 = vld [vmem:[#allocation10 + $0x1b8] sm:$0xff]  ;;  %v231_v57 = vld [vmem:[#allocation7 + $0x1e0] sm:$0xff] }
  0xa6   :  { %v789_v26 = vadd.f32 %v788_v15, %v725_v3  ;;  %v288_v3 = vld [vmem:[#allocation9 + $0x1a8] sm:$0xff]  ;;  %v542_v15 = vmul.f32 %v478_v51, %v478_v51  ;;  %v733_v28 = vsub.f32 %v541_v4, %v669_v5  ;;  %v672_v38 = vmul.f32 0.01, %v608_v22  ;;  %v170_v4 = vld [vmem:[#allocation4 + $0x1f8] sm:$0xff] }
  0xa7   :  { %v481_v21 = vsub.f32 %v417_v61, %v288_v3  ;;  %v359_v41 = vadd.f32 %v1075_v2, %v166_v23  ;;  %v421_v42 = vsub.f32 %v357_v19, %v228_v24  ;;  %v673_v49 = vmul.f32 0.01, %v609_v33  ;;  %v612_v3 = vld [vmem:[#allocation10 + $0x1c0] sm:$0xff]  ;;  %v232_v5 = vld [vmem:[#allocation7 + $0x1e8] sm:$0xff]  ;;  %v614_v24 = vld [vmem:[#allocation10 + $0x1d0] sm:$0xff] }
  0xa8   :  { %v790_v37 = vadd.f32 %v789_v26, %v726_v14  ;;  %v289_v14 = vld [vmem:[#allocation9 + $0x1b0] sm:$0xff]  ;;  %v543_v26 = vmul.f32 %v479_v62, %v479_v62  ;;  %v734_v39 = vsub.f32 %v542_v15, %v670_v16  ;;  %v360_v52 = vadd.f32 %v1075_v2, %v167_v34  ;;  %v295_v16 = vld [vmem:[#allocation9 + $0x1e0] sm:$0xff]  ;;  %v615_v33 = vld [vmem:[#allocation10 + $0x1d8] sm:$0xff] }
  0xa9   :  { %v482_v32 = vsub.f32 %v418_v9, %v289_v14  ;;  %v422_v53 = vsub.f32 %v358_v30, %v229_v35  ;;  %v674_v60 = vmul.f32 0.01, %v610_v44  ;;  %v361_v63 = vadd.f32 %v1075_v2, %v168_v45  ;;  %v613_v14 = vld [vmem:[#allocation10 + $0x1c8] sm:$0xff]  ;;  %v233_v15 = vld [vmem:[#allocation7 + $0x1f0] sm:$0xff] }
  0xaa   :  { %v791_v48 = vadd.f32 %v790_v37, %v727_v25  ;;  %v290_v25 = vld [vmem:[#allocation9 + $0x1b8] sm:$0xff]  ;;  %v544_v37 = vmul.f32 %v480_v10, %v480_v10  ;;  %v735_v50 = vsub.f32 %v543_v26, %v671_v27  ;;  %v423_v0 = vsub.f32 %v359_v41, %v230_v46  ;;  %v296_v26 = vld [vmem:[#allocation9 + $0x1e8] sm:$0xff]  ;;  %v297_v34 = vld [vmem:[#allocation9 + $0x1f0] sm:$0xff] }
  0xab   :  { %v483_v43 = vsub.f32 %v419_v20, %v290_v25  ;;  %v675_v8 = vmul.f32 0.01, %v611_v55  ;;  %v362_v11 = vadd.f32 %v1075_v2, %v169_v56  ;;  %v424_v12 = vsub.f32 %v360_v52, %v231_v57  ;;  %v234_v25 = vld [vmem:[#allocation7 + $0x1f8] sm:$0xff] }
  0xac   :  { %v792_v59 = vadd.f32 %v791_v48, %v728_v36  ;;  %v291_v36 = vld [vmem:[#allocation9 + $0x1c0] sm:$0xff]  ;;  %v545_v48 = vmul.f32 %v481_v21, %v481_v21  ;;  %v736_v61 = vsub.f32 %v544_v37, %v672_v38  ;;  %v363_v21 = vadd.f32 %v1075_v2, %v170_v4  ;;  %v298_v41 = vld [vmem:[#allocation9 + $0x1f8] sm:$0xff] }
  0xad   :  { %v484_v54 = vsub.f32 %v420_v31, %v291_v36  ;;  %v425_v22 = vsub.f32 %v361_v63, %v232_v5  ;;  %v426_v31 = vsub.f32 %v362_v11, %v233_v15  ;;  %v678_v36 = vmul.f32 0.01, %v614_v24  ;;  %v616_v2 = vld [vmem:[#allocation10 + $0x1e0] sm:$0xff] }
  0xae   :  { %v793_v7 = vadd.f32 %v792_v59, %v729_v47  ;;  %v292_v47 = vld [vmem:[#allocation9 + $0x1c8] sm:$0xff]  ;;  %v546_v59 = vmul.f32 %v482_v32, %v482_v32  ;;  %v737_v9 = vsub.f32 %v545_v48, %v673_v49  ;;  %v488_v32 = vsub.f32 %v424_v12, %v295_v16 }
  0xaf   :  { %v485_v1 = vsub.f32 %v421_v42, %v292_v47  ;;  %v490_v46 = vsub.f32 %v426_v31, %v297_v34  ;;  %v617_v47 = vld [vmem:[#allocation10 + $0x1e8] sm:$0xff]  ;;  %v680_v49 = vmul.f32 0.01, %v616_v2 }
  0xb0   :  { %v794_v18 = vadd.f32 %v793_v7, %v730_v58  ;;  %v293_v58 = vld [vmem:[#allocation9 + $0x1d0] sm:$0xff]  ;;  %v547_v7 = vmul.f32 %v483_v43, %v483_v43  ;;  %v738_v19 = vsub.f32 %v546_v59, %v674_v60  ;;  %v679_v43 = vmul.f32 0.01, %v615_v33 }
  0xb1   :  { %v486_v13 = vsub.f32 %v422_v53, %v293_v58  ;;  %v549_v27 = vmul.f32 %v485_v1, %v485_v1  ;;  %v552_v48 = vmul.f32 %v488_v32, %v488_v32  ;;  %v618_v53 = vld [vmem:[#allocation10 + $0x1f0] sm:$0xff]  ;;  %v681_v55 = vmul.f32 0.01, %v617_v47  ;;  %v619_v58 = vld [vmem:[#allocation10 + $0x1f8] sm:$0xff] }
  0xb2   :  { %v795_v29 = vadd.f32 %v794_v18, %v731_v6  ;;  %v294_v6 = vld [vmem:[#allocation9 + $0x1d8] sm:$0xff]  ;;  %v676_v18 = vmul.f32 0.01, %v612_v3  ;;  %v554_v59 = vmul.f32 %v490_v46, %v490_v46  ;;  %v682_v60 = vmul.f32 0.01, %v618_v53 }
  0xb3   :  { %v487_v23 = vsub.f32 %v423_v0, %v294_v6  ;;  %v550_v35 = vmul.f32 %v486_v13, %v486_v13  ;;  %v683_v0 = vmul.f32 0.01, %v619_v58 }
  0xb4   :  { %v796_v40 = vadd.f32 %v795_v29, %v732_v17  ;;  %v548_v17 = vmul.f32 %v484_v54, %v484_v54  ;;  %v739_v29 = vsub.f32 %v547_v7, %v675_v8  ;;  %v746_v4 = vsub.f32 %v554_v59, %v682_v60 }
  0xb5   :  { %v551_v42 = vmul.f32 %v487_v23, %v487_v23 }
  0xb6   :  { %v797_v51 = vadd.f32 %v796_v40, %v733_v28  ;;  %v677_v28 = vmul.f32 0.01, %v613_v14  ;;  %v740_v37 = vsub.f32 %v548_v17, %v676_v18  ;;  %v489_v40 = vsub.f32 %v425_v22, %v296_v26 }
  0xb7   :  { %v743_v56 = vsub.f32 %v551_v42, %v679_v43 }
  0xb8   :  { %v798_v62 = vadd.f32 %v797_v51, %v734_v39  ;;  %v427_v39 = vsub.f32 %v363_v21, %v234_v25  ;;  %v741_v44 = vsub.f32 %v549_v27, %v677_v28  ;;  %v553_v54 = vmul.f32 %v489_v40, %v489_v40 }
  0xba   :  { %v799_v10 = vadd.f32 %v798_v62, %v735_v50  ;;  %v742_v50 = vsub.f32 %v550_v35, %v678_v36  ;;  %v491_v52 = vsub.f32 %v427_v39, %v298_v41  ;;  %v745_v1 = vsub.f32 %v553_v54, %v681_v55 }
  0xbc   :  { %v800_v20 = vadd.f32 %v799_v10, %v736_v61  ;;  %v744_v61 = vsub.f32 %v552_v48, %v680_v49  ;;  %v555_v63 = vmul.f32 %v491_v52, %v491_v52 }
  0xbe   :  { %v801_v30 = vadd.f32 %v800_v20, %v737_v9  ;;  %v747_v6 = vsub.f32 %v555_v63, %v683_v0 }
  0xc0   :  { %v802_v38 = vadd.f32 %v801_v30, %v738_v19 }
  0xc2   :  { %v803_v45 = vadd.f32 %v802_v38, %v739_v29 }
  0xc4   :  { %v804_v51 = vadd.f32 %v803_v45, %v740_v37 }
  0xc6   :  { %v805_v57 = vadd.f32 %v804_v51, %v741_v44 }
  0xc8   :  { %v806_v62 = vadd.f32 %v805_v57, %v742_v50 }
  0xca   :  { %v807_v3 = vadd.f32 %v806_v62, %v743_v56 }
  0xcc   :  { %v808_v5 = vadd.f32 %v807_v3, %v744_v61 }
  0xce   :  { %v809_v7 = vadd.f32 %v808_v5, %v745_v1 }
  0xd0   :  { %v810_v8 = vadd.f32 %v809_v7, %v746_v4 }
  0xd2   :  { %v811_v9 = vadd.f32 %v810_v8, %v747_v6 }
  0xd4   :  { %818 = vst [vmem:[#allocation12] sm:$0xff] %v811_v9 }
  0xd5   :  { %942 = shalt.err (!%p939_p8)
}
  0xd6   :  { %s943_s19 = scalar_lea.hbm %s1158_s5, 128 }
  0xd7   :  { %p944_p9 = scmp.ne.s32.totalorder %s1158_s5, %s943_s19  ;;  %p947_p10 = scmp.lt.u32.totalorder %s943_s19, %s1158_s5 }
  0xd9   :  { %p949_p11 = pnand %p947_p10, %p944_p9 }
  0xdb   :  { %952 = shalt.err (!%p949_p11)
}
  0xdc   :  { %828 = dma.vmem_to_hbm [thread:$0]  %s826_s4, 128, %s1158_s5, [#allocation6]  }
  0xdd   :  { %959 = dma.done.wait [#allocation6], 128  }
  0xde   :  { %960 = vsyncadd [#allocation6], 4294967168 }
  0xdf   :  { %832 = vsyncpa [#allocation5], 1 }
  0xe0   :  { %833 = vsyncpa [#allocation8], 1 }
  0xe1   :  { %834 = vsyncpa [#allocation11], 1 }
  0xe2   :  { %835 = vsyncpa [#allocation6], 1 }

</bundles_post_ra>
